<compile_context>
chip_gen: v5e
topology: v5e:2x2
jax: 0.10.0
libtpu: 0.0.40
codegen_flags: <defaults>
</compile_context>

<pallas_src>
import jax
import jax.numpy as jnp
import numpy as np
from jax.experimental import pallas as pl
from jax.experimental.pallas import tpu as pltpu

ALPHA = 4

# Max number of simultaneously in-flight HBM->HBM frame copies (one DMA
# semaphore each).  Semaphore scratch is negligible; 32 covers every realistic
# SlowFast clip (t_slow = T // 4), so the issue loop normally contains no waits.
_MAX_INFLIGHT = 32


def _slow_gather_dma_kernel(idx_ref, frames_ref, out_ref, sem):
    """Pure-DMA temporal gather: out[:, t] = frames[:, idx[t]].

    `frames_ref` / `out_ref` live in HBM (memory_space=pl.ANY); the body issues
    one direct HBM->HBM async copy per selected frame, keeping up to
    sem.shape[0] of them in flight.  No VMEM staging, no per-frame grid steps.
    """
    t_slow = idx_ref.shape[0]            # static (trace-time) frame count
    nring = sem.shape[0]                 # = min(t_slow, _MAX_INFLIGHT)

    # Hoist ALL SMEM index reads before any DMA start/wait: .wait() breaks
    # SMEM sst->sld forwarding, so scalar loads must not interleave with waits.
    src_idx = [idx_ref[t] for t in range(t_slow)]

    descs = [None] * t_slow
    for t in range(t_slow):              # static unroll: t_slow = T // ALPHA is small
        slot = t % nring
        if t >= nring:
            # Slot reuse (only when t_slow > _MAX_INFLIGHT): wait on the exact
            # descriptor that was started on this semaphore, so the expected
            # byte count can never diverge from the issued copy.
            descs[t - nring].wait()
        d = pltpu.make_async_copy(
            frames_ref.at[:, pl.ds(src_idx[t], 1)],
            out_ref.at[:, pl.ds(t, 1)],
            sem.at[slot],
        )
        d.start()
        descs[t] = d

    # Drain every still-outstanding copy (all of them when t_slow <= nring).
    for t in range(max(0, t_slow - nring), t_slow):
        descs[t].wait()


def _slow_pathway_indices(num_frames: int, t_slow: int) -> np.ndarray:
    """Emulate torch.linspace(0, T-1, T//alpha).long(): float32 arithmetic,
    then truncation toward zero (values are >= 0, so trunc == floor)."""
    if t_slow <= 0:
        return np.zeros((0,), dtype=np.int32)
    if t_slow == 1:
        return np.zeros((1,), dtype=np.int32)
    step = np.float32(num_frames - 1) / np.float32(t_slow - 1)
    vals = np.arange(t_slow, dtype=np.float32) * step        # float32, like torch
    idx = vals.astype(np.int64)                               # trunc toward zero
    return np.clip(idx, 0, num_frames - 1).astype(np.int32)


def pack_pathway(frames: jax.Array, *, use_pallas=None):
    """frames: (C, T, H, W). Returns [slow_pathway, fast_pathway]."""
    C, T, H, W = frames.shape
    t_slow = T // ALPHA

    fast = frames  # identity pathway: zero data movement

    if t_slow == 0:
        # Degenerate clip (T < alpha): empty slow pathway, matching torch.
        return [frames[:, :0], fast]

    idx = _slow_pathway_indices(T, t_slow)

    if use_pallas is None:
        # Below a few MiB the copy finishes in well under the pallas_call
        # dispatch + descriptor-issue cost (especially on v7x at 3.2 TB/s), so
        # XLA's fused gather wins.  The DMA kernel is for real video clips.
        slow_bytes = C * t_slow * H * W * frames.dtype.itemsize
        use_pallas = slow_bytes >= (4 << 20)
    if not use_pallas:
        return [jnp.take(frames, jnp.asarray(idx), axis=1), fast]

    nring = min(t_slow, _MAX_INFLIGHT)

    slow = pl.pallas_call(
        _slow_gather_dma_kernel,
        out_shape=jax.ShapeDtypeStruct((C, t_slow, H, W), frames.dtype),
        grid_spec=pltpu.PrefetchScalarGridSpec(
            num_scalar_prefetch=1,                 # gather indices -> SMEM
            grid=(1,),                             # single invocation; DMAs do the work
            in_specs=[pl.BlockSpec(memory_space=pl.ANY)],   # frames stay in HBM
            out_specs=pl.BlockSpec(memory_space=pl.ANY),    # output stays in HBM
            scratch_shapes=[pltpu.SemaphoreType.DMA((nring,))],
        ),
        compiler_params=pltpu.CompilerParams(
            dimension_semantics=("arbitrary",),
        ),
    )(jnp.asarray(idx, dtype=jnp.int32), frames)

    return [slow, fast]


if __name__ == "__main__":
    key = jax.random.PRNGKey(0)

    # Primary small test: 3 channels, 8 frames, 8x128 spatial.
    C, T, H, W = 3, 8, 8, 128
    frames = jax.random.normal(key, (C, T, H, W), dtype=jnp.float32)

    # Force the Pallas DMA path even at this toy size so the kernel is exercised.
    slow, fast = pack_pathway(frames, use_pallas=True)
    jax.block_until_ready(slow)
    jax.block_until_ready(fast)

    t_slow = T // ALPHA
    ref_idx = _slow_pathway_indices(T, t_slow)
    slow_ref = jnp.take(frames, jnp.asarray(ref_idx), axis=1)

    assert slow.shape == (C, t_slow, H, W)
    assert fast.shape == (C, T, H, W)
    np.testing.assert_array_equal(np.asarray(slow), np.asarray(slow_ref))
    np.testing.assert_array_equal(np.asarray(fast), np.asarray(frames))

    # Parity sweep over several clip lengths (including a non-lane-multiple
    # spatial size and a degenerate T < alpha clip) to exercise the index
    # emulation and the DMA gather at different t_slow.
    for T2, H2, W2 in [(4, 8, 128), (12, 8, 96), (16, 8, 128), (2, 8, 128)]:
        f2 = jax.random.normal(jax.random.PRNGKey(T2), (C, T2, H2, W2),
                               dtype=jnp.float32)
        t2 = T2 // ALPHA
        s2, _ = pack_pathway(f2, use_pallas=(t2 > 0))
        jax.block_until_ready(s2)
        idx2 = _slow_pathway_indices(T2, t2)
        ref2 = jnp.take(f2, jnp.asarray(idx2), axis=1) if t2 > 0 else f2[:, :0]
        assert s2.shape == (C, t2, H2, W2)
        np.testing.assert_array_equal(np.asarray(s2), np.asarray(ref2))

    print("KERNEL_OK")
</pallas_src>

<mosaic_0001>
module attributes {stable_mosaic.version = 11 : i64} {
  func.func @_slow_gather_dma_kernel(%arg0: i32, %arg1: memref<2xi32, #tpu.memory_space<smem>>, %arg2: memref<3x8x8x128xf32, #tpu.memory_space<any>>, %arg3: memref<3x2x8x128xf32, #tpu.memory_space<any>>, %arg4: memref<2x!tpu.dma_semaphore, #tpu.memory_space<semaphore_mem>>) attributes {dimension_semantics = [#tpu.dimension_semantics<arbitrary>], iteration_bounds = array<i64: 1>, scalar_prefetch = 1 : i64, scratch_operands = 1 : i64, tpu.core_type = #tpu.core_type<tc>, window_params = [{}, {}]} {
    %c0 = arith.constant 0 : index
    %0 = memref.load %arg1[%c0] : memref<2xi32, #tpu.memory_space<smem>>
    %c1 = arith.constant 1 : index
    %1 = memref.load %arg1[%c1] : memref<2xi32, #tpu.memory_space<smem>>
    %c0_i32 = arith.constant 0 : i32
    %c0_i32_0 = arith.constant 0 : i32
    %c0_i32_1 = arith.constant 0 : i32
    %c0_i32_2 = arith.constant 0 : i32
    %2 = tpu.memref_slice %arg2[%c0_i32_0, %0, %c0_i32_1, %c0_i32_2] : memref<3x8x8x128xf32, #tpu.memory_space<any>> -> memref<3x1x8x128xf32, #tpu.memory_space<any>>
    %c0_i32_3 = arith.constant 0 : i32
    %c0_i32_4 = arith.constant 0 : i32
    %c0_i32_5 = arith.constant 0 : i32
    %c0_i32_6 = arith.constant 0 : i32
    %3 = tpu.memref_slice %arg3[%c0_i32_3, %c0_i32_4, %c0_i32_5, %c0_i32_6] : memref<3x2x8x128xf32, #tpu.memory_space<any>> -> memref<3x1x8x128xf32, #tpu.memory_space<any>>
    %4 = tpu.memref_slice %arg4[%c0_i32] : memref<2x!tpu.dma_semaphore, #tpu.memory_space<semaphore_mem>> -> memref<1x!tpu.dma_semaphore, #tpu.memory_space<semaphore_mem>>
    %5 = tpu.memref_squeeze %4 : memref<1x!tpu.dma_semaphore, #tpu.memory_space<semaphore_mem>> -> memref<!tpu.dma_semaphore, #tpu.memory_space<semaphore_mem>>
    tpu.enqueue_dma source(%2 : memref<3x1x8x128xf32, #tpu.memory_space<any>>) target(%3 : memref<3x1x8x128xf32, #tpu.memory_space<any>>) target_semaphore(%5 : memref<!tpu.dma_semaphore, #tpu.memory_space<semaphore_mem>>)
    %c1_i32 = arith.constant 1 : i32
    %c0_i32_7 = arith.constant 0 : i32
    %c0_i32_8 = arith.constant 0 : i32
    %c0_i32_9 = arith.constant 0 : i32
    %6 = tpu.memref_slice %arg2[%c0_i32_7, %1, %c0_i32_8, %c0_i32_9] : memref<3x8x8x128xf32, #tpu.memory_space<any>> -> memref<3x1x8x128xf32, #tpu.memory_space<any>>
    %c0_i32_10 = arith.constant 0 : i32
    %c1_i32_11 = arith.constant 1 : i32
    %c0_i32_12 = arith.constant 0 : i32
    %c0_i32_13 = arith.constant 0 : i32
    %7 = tpu.memref_slice %arg3[%c0_i32_10, %c1_i32_11, %c0_i32_12, %c0_i32_13] : memref<3x2x8x128xf32, #tpu.memory_space<any>> -> memref<3x1x8x128xf32, #tpu.memory_space<any>>
    %8 = tpu.memref_slice %arg4[%c1_i32] : memref<2x!tpu.dma_semaphore, #tpu.memory_space<semaphore_mem>> -> memref<1x!tpu.dma_semaphore, #tpu.memory_space<semaphore_mem>>
    %9 = tpu.memref_squeeze %8 : memref<1x!tpu.dma_semaphore, #tpu.memory_space<semaphore_mem>> -> memref<!tpu.dma_semaphore, #tpu.memory_space<semaphore_mem>>
    tpu.enqueue_dma source(%6 : memref<3x1x8x128xf32, #tpu.memory_space<any>>) target(%7 : memref<3x1x8x128xf32, #tpu.memory_space<any>>) target_semaphore(%9 : memref<!tpu.dma_semaphore, #tpu.memory_space<semaphore_mem>>)
    %c0_i32_14 = arith.constant 0 : i32
    %c0_i32_15 = arith.constant 0 : i32
    %c0_i32_16 = arith.constant 0 : i32
    %c0_i32_17 = arith.constant 0 : i32
    %10 = tpu.memref_slice %arg2[%c0_i32_15, %0, %c0_i32_16, %c0_i32_17] : memref<3x8x8x128xf32, #tpu.memory_space<any>> -> memref<3x1x8x128xf32, #tpu.memory_space<any>>
    %c0_i32_18 = arith.constant 0 : i32
    %c0_i32_19 = arith.constant 0 : i32
    %c0_i32_20 = arith.constant 0 : i32
    %c0_i32_21 = arith.constant 0 : i32
    %11 = tpu.memref_slice %arg3[%c0_i32_18, %c0_i32_19, %c0_i32_20, %c0_i32_21] : memref<3x2x8x128xf32, #tpu.memory_space<any>> -> memref<3x1x8x128xf32, #tpu.memory_space<any>>
    %12 = tpu.memref_slice %arg4[%c0_i32_14] : memref<2x!tpu.dma_semaphore, #tpu.memory_space<semaphore_mem>> -> memref<1x!tpu.dma_semaphore, #tpu.memory_space<semaphore_mem>>
    %13 = tpu.memref_squeeze %12 : memref<1x!tpu.dma_semaphore, #tpu.memory_space<semaphore_mem>> -> memref<!tpu.dma_semaphore, #tpu.memory_space<semaphore_mem>>
    tpu.wait_dma2 semaphore(%13 : memref<!tpu.dma_semaphore, #tpu.memory_space<semaphore_mem>>) src(%10 : memref<3x1x8x128xf32, #tpu.memory_space<any>>) dst(%11 : memref<3x1x8x128xf32, #tpu.memory_space<any>>)
    %c1_i32_22 = arith.constant 1 : i32
    %c0_i32_23 = arith.constant 0 : i32
    %c0_i32_24 = arith.constant 0 : i32
    %c0_i32_25 = arith.constant 0 : i32
    %14 = tpu.memref_slice %arg2[%c0_i32_23, %1, %c0_i32_24, %c0_i32_25] : memref<3x8x8x128xf32, #tpu.memory_space<any>> -> memref<3x1x8x128xf32, #tpu.memory_space<any>>
    %c0_i32_26 = arith.constant 0 : i32
    %c1_i32_27 = arith.constant 1 : i32
    %c0_i32_28 = arith.constant 0 : i32
    %c0_i32_29 = arith.constant 0 : i32
    %15 = tpu.memref_slice %arg3[%c0_i32_26, %c1_i32_27, %c0_i32_28, %c0_i32_29] : memref<3x2x8x128xf32, #tpu.memory_space<any>> -> memref<3x1x8x128xf32, #tpu.memory_space<any>>
    %16 = tpu.memref_slice %arg4[%c1_i32_22] : memref<2x!tpu.dma_semaphore, #tpu.memory_space<semaphore_mem>> -> memref<1x!tpu.dma_semaphore, #tpu.memory_space<semaphore_mem>>
    %17 = tpu.memref_squeeze %16 : memref<1x!tpu.dma_semaphore, #tpu.memory_space<semaphore_mem>> -> memref<!tpu.dma_semaphore, #tpu.memory_space<semaphore_mem>>
    tpu.wait_dma2 semaphore(%17 : memref<!tpu.dma_semaphore, #tpu.memory_space<semaphore_mem>>) src(%14 : memref<3x1x8x128xf32, #tpu.memory_space<any>>) dst(%15 : memref<3x1x8x128xf32, #tpu.memory_space<any>>)
    return
  }
}

</mosaic_0001>

<bundles_post_ra>
// kernel: tpu_custom_call.1
= control target key start
LH: loop header
LB: loop body
LE: loop exit
PB: predicated region body
PF: predicated region fallthrough
CT: control target
= control target key end

     0   :  { %s115_s12 = smov [#allocation4]   ;;  %s154_s0 = inlined_call_operand.hbm [shape: s32[2], index: 0, kind: input, shape index: {}]   ;;  %s155_s1 = inlined_call_operand.hbm [shape: f32[3,8,8,128], index: 1, kind: input, shape index: {}]   ;;  %s156_s2 = inlined_call_operand.hbm [shape: f32[3,2,8,128], index: 2, kind: output, shape index: {}]  }
   0x1   :  { %s8_s11 = sshll.u32 %s154_s0, 4  ;;  %s9_s11 = int_to_ptr.hbm [resolvable:$true] %s8_s11 }
   0x2   :  { %11 = dma.hbm_to_smem %s9_s11, 16, %s115_s12, [#allocation3] }
   0x3   :  { %109 = dma.done.wait [#allocation3], 16 }
   0x4   :  { %110 = vsyncadd [#allocation3], 4294967280 }
   0x5   :  { %14 = sfence }
   0x6   :  { %s15_s13 = sld [smem:[#allocation4]]  ;;  %s25_s16 = sshll.u32 %s156_s2, 4  ;;  %s26_s16 = int_to_ptr.hbm [resolvable:$true] %s25_s16 }
   0x7   :  { %s83_s17 = sld [smem:[#allocation4 + $0x1]]  ;;  %s116_s18 = smov 1024  }
   0x8   :  { %30 = sst [smem:[#allocation6]] %s116_s18  ;;  %s117_s19 = smov 256  }
   0x9   :  { %32 = sst [smem:[#allocation6 + $0x1]] %s117_s19  ;;  %s118_s20 = smov 8  }
   0xa   :  { %34 = sst [smem:[#allocation6 + $0x2]] %s118_s20  ;;  %s39_s3 = scalar_lea.hbm %s156_s2, 8 }
   0xb   :  { %s119_s4 = smov [#allocation2]   ;;  %s120_s5 = smov [#allocation5]  }
   0xc   :  { %s84_s0 = sshll.u32 %s15_s13, 3  ;;  %s121_s6 = smov 0  }
   0xd   :  { %s18_s23 = scalar_lea.hbm %s155_s1, %s84_s0  ;;  %s85_s24 = sshll.u32 %s83_s17, 3 }
   0xe   :  { %s23_s25 = sshll.u32 %s18_s23, 4  ;;  %s38_s28 = scalar_lea.hbm %s155_s1, %s85_s24  ;;  %s24_s25 = int_to_ptr.hbm [resolvable:$true] %s23_s25 }
   0xf   :  { %36 = dma.general %s24_s25, 384, %s26_s16, %s119_s4, %s120_s5, [#allocation6], %s121_s6, 0  }
  0x10   :  { %52 = sst [smem:[#allocation8]] %s116_s18  ;;  %s45_s7 = sshll.u32 %s38_s28, 4  ;;  %s46_s7 = int_to_ptr.hbm [resolvable:$true] %s45_s7 }
  0x11   :  { %54 = sst [smem:[#allocation8 + $0x1]] %s117_s19  ;;  %s47_s8 = sshll.u32 %s39_s3, 4  ;;  %s48_s8 = int_to_ptr.hbm [resolvable:$true] %s47_s8 }
  0x12   :  { %56 = sst [smem:[#allocation8 + $0x2]] %s118_s20  ;;  %s122_s9 = smov [#allocation2 + $0x1]  }
  0x13   :  { %s123_s10 = smov [#allocation7]  }
  0x14   :  { %58 = dma.general %s46_s7, 384, %s48_s8, %s122_s9, %s123_s10, [#allocation8], %s121_s6, 0  }
  0x15   :  { %111 = dma.done.wait [#allocation2], 384 }
  0x16   :  { %112 = vsyncadd [#allocation2], 4294966912 }
  0x17   :  { %113 = dma.done.wait [#allocation2 + $0x1], 384 }
  0x18   :  { %114 = vsyncadd [#allocation2 + $0x1], 4294966912 }
  0x19   :  { %66 = vsyncmov [#allocation2] }
  0x1c   :  { %s67_s1 = vpop.sfrf %66 }
  0x1d   :  { %p86_p0 = scmp.ne.s32.totalorder %s67_s1, 0 }
  0x1f   :  { %71 = shalt.err (%p86_p0)  }
  0x20   :  { %73 = vsyncmov [#allocation2 + $0x1] }
  0x23   :  { %s74_s2 = vpop.sfrf %73 }
  0x24   :  { %p87_p1 = scmp.ne.s32.totalorder %s74_s2, 0 }
  0x26   :  { %78 = shalt.err (%p87_p1)  }

</bundles_post_ra>
